<compile_context>
chip_gen: v6e
topology: v6e:2x2x1
jax: 0.10.0
libtpu: 0.0.40
codegen_flags: <defaults>
</compile_context>

<pallas_src>
import functools

import jax
import jax.numpy as jnp
import numpy as np
from jax.experimental import pallas as pl
from jax.experimental.pallas import tpu as pltpu


def _bernoulli_leaf_kernel(x_ref, o_ref, *, eps, log_w, log_1mw, res_nan, res_query):
    xv = x_ref[...]                               # f32 (8, TW)
    unobs = jnp.isnan(xv)                         # unobserved entries
    x = jnp.where(unobs, 0.0, xv)                 # torch: x[unobs] = 0

    a = jnp.log(x + eps) + log_w                  # x * log P(X=1)
    b = jnp.log(1.0 - x + eps) + log_1mw          # (1-x) * log P(X=0)
    # 2-way logsumexp; a, b are finite for x in [0, 1] (eps keeps log args > 0).
    # x == -1 (query) produces NaN here but is overridden by the final `where`.
    m = jnp.maximum(a, b)
    res = m + jnp.log(jnp.exp(a - m) + jnp.exp(b - m))

    res = jnp.where(unobs, res_nan, res)          # NaN (unobserved) fallback
    res = jnp.where(x != -1.0, res, res_query)    # query (-1) fallback
    o_ref[...] = res


def bernoulli_leaf_forward(inp_x, scope, p, eps=1e-6):
    """inp_x: f32[B, D] (or f32[D]); scope: int column index; p: Bernoulli prob."""
    if inp_x.ndim == 1:
        inp_x = inp_x[None, :]
    # TODO(synk): the two-column soft-evidence branch (scope selecting two columns,
    # x.ndim == 2 after selection) is not wired up; only the scalar-scope path is.
    x = inp_x[:, scope].astype(jnp.float32)       # (B,)
    B = x.shape[0]

    # precompute() constants (host side, exactly as in the module __init__)
    log_w = float(np.log(p + eps))
    log_1mw = float(np.log(1.0 - p + eps))
    res_nan = float(np.logaddexp(log_w, log_1mw))
    res_query = log_w if p > 0.5 else log_1mw

    SUB, LANE, TW_BIG = 8, 128, 2048
    max_single = SUB * TW_BIG                     # 16384 elems = one 64 KiB f32 block
    if B <= max_single:
        B_pad = pl.cdiv(B, SUB * LANE) * (SUB * LANE)   # min (8,128) alignment
        TW = B_pad // SUB                                # whole array = one block
    else:
        B_pad = pl.cdiv(B, SUB * TW_BIG) * (SUB * TW_BIG)
        TW = TW_BIG
    W = B_pad // SUB
    grid = (W // TW,)

    x_pad = jnp.zeros((B_pad,), jnp.float32).at[:B].set(x)
    x2 = x_pad.reshape(SUB, W)

    kernel = functools.partial(
        _bernoulli_leaf_kernel, eps=eps, log_w=log_w, log_1mw=log_1mw,
        res_nan=res_nan, res_query=res_query)

    out2 = pl.pallas_call(
        kernel,
        out_shape=jax.ShapeDtypeStruct((SUB, W), jnp.float32),
        grid=grid,
        in_specs=[pl.BlockSpec((SUB, TW), lambda i: (0, i))],
        out_specs=pl.BlockSpec((SUB, TW), lambda i: (0, i)),
        compiler_params=pltpu.CompilerParams(dimension_semantics=("parallel",)),
    )(x2)

    return out2.reshape(B_pad)[:B]


def bernoulli_leaf_ref(inp_x, scope, p, eps=1e-6):
    """Plain-JAX reference (same math as the PyTorch forward, scalar scope)."""
    if inp_x.ndim == 1:
        inp_x = inp_x[None, :]
    x_raw = inp_x[:, scope].astype(jnp.float32)
    unobs = jnp.isnan(x_raw)
    x = jnp.where(unobs, 0.0, x_raw)
    log_w = np.log(p + eps)
    log_1mw = np.log(1.0 - p + eps)
    res_nan = np.logaddexp(log_w, log_1mw)
    res_query = log_w if p > 0.5 else log_1mw
    res = jnp.logaddexp(jnp.log(x + eps) + log_w, jnp.log(1.0 - x + eps) + log_1mw)
    res = jnp.where(unobs, res_nan, res)
    res = jnp.where(x != -1.0, res, res_query)
    return res


if __name__ == "__main__":
    key = jax.random.PRNGKey(0)
    p, eps, scope = 0.7, 1e-6, 2

    def make_input(k, B, D=4):
        k1, k2, k3 = jax.random.split(k, 3)
        inp = jax.random.uniform(k1, (B, D), dtype=jnp.float32)
        col = inp[:, scope]
        nan_mask = jax.random.bernoulli(k2, 0.15, (B,))
        qry_mask = jnp.logical_and(jax.random.bernoulli(k3, 0.15, (B,)),
                                   jnp.logical_not(nan_mask))
        col = jnp.where(nan_mask, jnp.nan, col)   # unobserved entries
        col = jnp.where(qry_mask, -1.0, col)      # query entries
        return inp.at[:, scope].set(col)

    k_small, k_big = jax.random.split(key)

    # Small batch -> single-block path.
    inp_small = make_input(k_small, 257)
    out_small = jax.block_until_ready(bernoulli_leaf_forward(inp_small, scope, p, eps))
    ref_small = bernoulli_leaf_ref(inp_small, scope, p, eps)
    assert out_small.shape == (257,)
    assert jnp.allclose(out_small, ref_small, atol=1e-5, rtol=1e-5)

    # Larger batch -> tiled (gridded, parallel) path.
    inp_big = make_input(k_big, 20000)
    out_big = jax.block_until_ready(bernoulli_leaf_forward(inp_big, scope, p, eps))
    ref_big = bernoulli_leaf_ref(inp_big, scope, p, eps)
    assert out_big.shape == (20000,)
    assert jnp.allclose(out_big, ref_big, atol=1e-5, rtol=1e-5)

    print("KERNEL_OK")
</pallas_src>

<mosaic_0001>
module attributes {stable_mosaic.version = 11 : i64} {
  func.func @_bernoulli_leaf_kernel(%arg0: i32, %arg1: memref<8x128xf32, #tpu.memory_space<vmem>>, %arg2: memref<8x128xf32, #tpu.memory_space<vmem>>) attributes {dimension_semantics = [#tpu.dimension_semantics<parallel>], iteration_bounds = array<i64: 1>, scalar_prefetch = 0 : i64, scratch_operands = 0 : i64, tpu.core_type = #tpu.core_type<tc>, window_params = [{transform_indices = @transform_0, window_bounds = array<i64: 8, 128>}, {transform_indices = @transform_1, window_bounds = array<i64: 8, 128>}]} {
    %c0 = arith.constant 0 : index
    %c0_0 = arith.constant 0 : index
    %0 = vector.load %arg1[%c0, %c0_0] : memref<8x128xf32, #tpu.memory_space<vmem>>, vector<8x128xf32>
    %1 = arith.cmpf one, %0, %0 : vector<8x128xf32>
    %cst = arith.constant 0.000000e+00 : f32
    %2 = vector.broadcast %cst : f32 to vector<8x128xf32>
    %3 = arith.select %1, %2, %0 : vector<8x128xi1>, vector<8x128xf32>
    %cst_1 = arith.constant 9.99999997E-7 : f32
    %4 = vector.broadcast %cst_1 : f32 to vector<8x128xf32>
    %5 = arith.addf %3, %4 : vector<8x128xf32>
    %6 = math.log %5 : vector<8x128xf32>
    %cst_2 = arith.constant -0.356673509 : f32
    %7 = vector.broadcast %cst_2 : f32 to vector<8x128xf32>
    %8 = arith.addf %6, %7 : vector<8x128xf32>
    %cst_3 = arith.constant 1.000000e+00 : f32
    %9 = vector.broadcast %cst_3 : f32 to vector<8x128xf32>
    %10 = arith.subf %9, %3 : vector<8x128xf32>
    %cst_4 = arith.constant 9.99999997E-7 : f32
    %11 = vector.broadcast %cst_4 : f32 to vector<8x128xf32>
    %12 = arith.addf %10, %11 : vector<8x128xf32>
    %13 = math.log %12 : vector<8x128xf32>
    %cst_5 = arith.constant -1.20396948 : f32
    %14 = vector.broadcast %cst_5 : f32 to vector<8x128xf32>
    %15 = arith.addf %13, %14 : vector<8x128xf32>
    %16 = arith.maximumf %8, %15 : vector<8x128xf32>
    %17 = arith.subf %8, %16 : vector<8x128xf32>
    %18 = math.exp %17 : vector<8x128xf32>
    %19 = arith.subf %15, %16 : vector<8x128xf32>
    %20 = math.exp %19 : vector<8x128xf32>
    %21 = arith.addf %18, %20 : vector<8x128xf32>
    %22 = math.log %21 : vector<8x128xf32>
    %23 = arith.addf %16, %22 : vector<8x128xf32>
    %cst_6 = arith.constant 1.99999795E-6 : f32
    %24 = vector.broadcast %cst_6 : f32 to vector<8x128xf32>
    %25 = arith.select %1, %24, %23 : vector<8x128xi1>, vector<8x128xf32>
    %cst_7 = arith.constant -1.000000e+00 : f32
    %26 = vector.broadcast %cst_7 : f32 to vector<8x128xf32>
    %27 = arith.cmpf one, %3, %26 : vector<8x128xf32>
    %cst_8 = arith.constant -0.356673509 : f32
    %28 = vector.broadcast %cst_8 : f32 to vector<8x128xf32>
    %29 = arith.select %27, %25, %28 : vector<8x128xi1>, vector<8x128xf32>
    %c0_9 = arith.constant 0 : index
    %c0_10 = arith.constant 0 : index
    %30 = vector.load %arg2[%c0_9, %c0_10] : memref<8x128xf32, #tpu.memory_space<vmem>>, vector<8x128xf32>
    tpu.vector_store %arg2[%c0_9, %c0_10], %29 {strides = array<i32>} : memref<8x128xf32, #tpu.memory_space<vmem>>, vector<8x128xf32>,
    return
  }
  func.func @transform_0(%arg0: i32) -> (i32, i32) {
    %c0_i32 = arith.constant 0 : i32
    %c0_i32_0 = arith.constant 0 : i32
    return %c0_i32, %arg0 : i32, i32
  }
  func.func @transform_1(%arg0: i32) -> (i32, i32) {
    %c0_i32 = arith.constant 0 : i32
    %c0_i32_0 = arith.constant 0 : i32
    return %c0_i32, %arg0 : i32, i32
  }
}

</mosaic_0001>

<bundles_post_ra>
// kernel: tpu_custom_call.1
= control target key start
LH: loop header
LB: loop body
LE: loop exit
PB: predicated region body
PF: predicated region fallthrough
CT: control target
= control target key end

     0   :  { %6 = vsyncpa [#allocation3], 0  ;;  %s139_s0 = inlined_call_operand.hbm [shape: f32[8,128], index: 0, kind: input, shape index: {}]   ;;  %s140_s1 = inlined_call_operand.hbm [shape: f32[8,128], index: 1, kind: output, shape index: {}]  }
   0x1   :  { %7 = vsyncpa [#allocation4], 0  ;;  %s119_s6 = smov [#allocation2]  }
   0x2   :  { %s14_s7 = sshll.u32 %s119_s6, 4  ;;  %s15_s7 = int_to_ptr.vmem [resolvable:$true] %s14_s7 }
   0x3   :  { %s83_s8 = scalar_lea.vmem %s15_s7, 128  ;;  %p88_p1 = scmp.lt.s32.totalorder %s15_s7, %s15_s7 }
   0x4   :  { %p84_p0 = scmp.ne.s32.totalorder %s15_s7, %s83_s8  ;;  %p89_p2 = scmp.lt.s32.totalorder %s83_s8, %s83_s8 }
   0x6   :  { %p90_p3 = por %p89_p2, %p88_p1 }
   0x8   :  { %p91_p4 = pnand %p90_p3, %p84_p0 }
   0xa   :  { %94 = shalt.err (!%p91_p4)
}
   0xb   :  { %17 = dma.hbm_to_vmem [thread:$0]  %s139_s0, 128, %s15_s7, [#allocation3]  }
   0xc   :  { %115 = dma.done.wait [#allocation3], 128  }
   0xd   :  { %116 = vsyncadd [#allocation3], 4294967168  ;;  %v21_v0 = vld [vmem:[#allocation2] sm:$0xff]  ;;  %s120_s0 = smov [#allocation5]  }
   0xe   :  { %vm22_vm0 = vcmp.ne.f32.partialorder %v21_v0, %v21_v0  ;;  %s54_s11 = sshll.u32 %s120_s0, 4  ;;  %s55_s11 = int_to_ptr.vmem [resolvable:$true] %s54_s11 }
   0xf   :  { %v23_v1 = vsel %vm22_vm0, 0.0, %v21_v0  ;;  %s95_s12 = scalar_lea.vmem %s55_s11, 128  ;;  %p100_p6 = scmp.lt.s32.totalorder %s55_s11, %s55_s11 }
  0x10   :  { %v24_v2 = vadd.f32 1e-06, %v23_v1  ;;  %v28_v3 = vsub.f32 1.0, %v23_v1  ;;  %vm45_vm1 = vcmp.ne.f32.partialorder %v23_v1, -1.0  ;;  %p96_p5 = scmp.ne.s32.totalorder %s55_s11, %s95_s12  ;;  %p101_p7 = scmp.lt.s32.totalorder %s95_s12, %s95_s12 }
  0x12   :  { %65 = vlog2.f32 %v24_v2  ;;  %v29_v4 = vadd.f32 1e-06, %v28_v3  ;;  %p102_p8 = por %p101_p7, %p100_p6 }
  0x14   :  { %67 = vlog2.f32 %v29_v4  ;;  %p103_p9 = pnand %p102_p8, %p96_p5 }
  0x1f   :  { %v66_v5 = vpop.eup %65 }
  0x20   :  { %v26_v6 = vmul.f32 0.6931472, %v66_v5 }
  0x21   :  { %v68_v7 = vpop.eup %67 }
  0x22   :  { %v27_v8 = vadd.f32 -0.3566735, %v26_v6  ;;  %v31_v9 = vmul.f32 0.6931472, %v68_v7 }
  0x24   :  { %v32_v10 = vadd.f32 -1.2039695, %v31_v9 }
  0x26   :  { %v33_v11 = vmax.f32 %v27_v8, %v32_v10 }
  0x28   :  { %v34_v12 = vsub.f32 %v27_v8, %v33_v11  ;;  %v37_v13 = vsub.f32 %v32_v10, %v33_v11 }
  0x2a   :  { %v35_v14 = vmul.f32 1.442695, %v34_v12  ;;  %v38_v15 = vmul.f32 1.442695, %v37_v13 }
  0x2c   :  { %69 = vpow2.f32 %v35_v14 }
  0x2d   :  { %71 = vpow2.f32 %v38_v15 }
  0x39   :  { %v70_v16 = vpop.eup %69 }
  0x3a   :  { %v72_v17 = vpop.eup %71 }
  0x3b   :  { %v40_v18 = vadd.f32 %v72_v17, %v70_v16 }
  0x3d   :  { %73 = vlog2.f32 %v40_v18 }
  0x4a   :  { %v74_v19 = vpop.eup %73 }
  0x4b   :  { %v42_v20 = vmul.f32 0.6931472, %v74_v19 }
  0x4d   :  { %v43_v21 = vadd.f32 %v42_v20, %v33_v11 }
  0x4f   :  { %v44_v22 = vsel %vm22_vm0, 1.999998e-06, %v43_v21 }
  0x50   :  { %v46_v23 = vsel %vm45_vm1, %v44_v22, -0.3566735 }
  0x51   :  { %47 = vst [vmem:[#allocation5] sm:$0xff] %v46_v23 }
  0x52   :  { %106 = shalt.err (!%p103_p9)
}
  0x53   :  { %57 = dma.vmem_to_hbm [thread:$0]  %s55_s11, 128, %s140_s1, [#allocation4]  }
  0x54   :  { %117 = dma.done.wait [#allocation4], 128  }
  0x55   :  { %118 = vsyncadd [#allocation4], 4294967168 }
  0x56   :  { %61 = vsyncpa [#allocation3], 1 }
  0x57   :  { %62 = vsyncpa [#allocation4], 1 }

</bundles_post_ra>
